<compile_context>
chip_gen: v7x
topology: tpu7x:2x2x1
jax: 0.10.0
libtpu: 0.0.40
codegen_flags: <defaults>
</compile_context>

<pallas_src>
import numpy as np

import jax
import jax.numpy as jnp
from jax import lax
from jax.experimental import pallas as pl
from jax.experimental.pallas import tpu as pltpu


_SUB = 8  # sublane group: rows per accumulator sub-tile and per tau chunk


def _round_up(x, m):
    return ((x + m - 1) // m) * m


# ----------------------------------------------------------------------------
# Kernel generation (RTF -> time-domain kernel).  Exact port of RTF.get_k().
# ----------------------------------------------------------------------------
def rtf_get_k(ab, h_0, d_model, num_a, state_size, trunc_len, l):
    assert trunc_len > state_size, "trunc_len must be larger than state_size"
    assert l <= trunc_len, "sequence length must not exceed trunc_len"
    a_channels = num_a
    pad_right = trunc_len - state_size - 1 + (trunc_len % 2)
    ab_p = jnp.pad(ab, ((0, 0), (1, pad_right)))
    ab_p = ab_p.at[:a_channels, 0].set(1.0)
    AB = jnp.fft.rfft(ab_p, axis=-1)
    A = jnp.repeat(AB[:a_channels], d_model // num_a, axis=0)        # 'D N -> (D R) N'
    K = AB[a_channels:] / A + h_0[:, None]
    k = jnp.fft.irfft(K, axis=-1)[:, :l]                              # (D, l)
    return k


# ----------------------------------------------------------------------------
# Pallas kernel: blocked causal depthwise convolution
#   y[t, c] = sum_{tau <= t} k[tau, c] * u[t - tau, c]   (c = folded (batch, channel) lane)
# ----------------------------------------------------------------------------
def _rtf_conv_kernel(it_ref, rt_ref, k_ref, up_ref, uc_ref, y_ref, acc_ref, cop_ref):
    # it_ref/rt_ref : (n_steps,) SMEM  flat triangular schedule: step s -> (i, r), r <= i
    # k_ref  : (TL, TC)  kernel rows  [r*TL, (r+1)*TL)   (batch-broadcast on lanes)
    # up_ref : (TL, TC)  input rows   [(i-r-1)*TL, (i-r)*TL)
    # uc_ref : (TL, TC)  input rows   [(i-r)*TL,  (i-r+1)*TL)
    # y_ref  : (TL, TC)  output rows  [i*TL, (i+1)*TL)
    # acc_ref: (TL, TC)  f32 accumulator, resident across the r (tau-block) steps of each i
    # cop_ref: (8*2*TL, TC) f32: 8 phase-shifted copies of the 2*TL causal window
    #          cop[q*2*TL + x] == win[x - q], win = prev_block ‖ cur_block
    TL, TC = y_ref.shape
    W = 2 * TL
    nsub = TL // _SUB
    s = pl.program_id(1)
    i = it_ref[s]
    r = rt_ref[s]

    # ---- init accumulator at the first tau-block of each output block ----
    @pl.when(r == 0)
    def _init():
        acc_ref[...] = jnp.zeros_like(acc_ref)

    # ---- phase-0 window: rows [0,TL) = previous block (zeros on the diagonal),
    #      rows [TL,2TL) = current block ----
    @pl.when(r == i)
    def _zero_prev():
        cop_ref[pl.ds(0, TL), :] = jnp.zeros((TL, TC), jnp.float32)

    @pl.when(r < i)
    def _load_prev():
        cop_ref[pl.ds(0, TL), :] = up_ref[...].astype(jnp.float32)

    cop_ref[pl.ds(TL, TL), :] = uc_ref[...].astype(jnp.float32)

    # ---- phase-q copies (q = 1..7): cop[q*W + x] = win[x - q] for x in [8, W).
    #      Rows [0, 8) of each shifted copy are never read (inner-loop reads start at
    #      row >= 8).  Built with aligned stores from (once-per-step) unaligned loads,
    #      so the hot inner loop below only ever issues aligned loads. ----
    big = 4 * _SUB
    total = W - _SUB
    nbig = total // big
    rem = (total % big) // _SUB
    for q in range(1, _SUB):
        dst0 = q * W + _SUB
        src0 = _SUB - q
        if nbig > 0:
            @pl.loop(0, nbig)
            def _copy_big(cidx, dst0=dst0, src0=src0):
                off = pl.multiple_of(cidx * big, _SUB)
                cop_ref[pl.ds(dst0 + off, big), :] = cop_ref[pl.ds(src0 + off, big), :]
        for g in range(rem):
            off = nbig * big + g * _SUB
            cop_ref[pl.ds(dst0 + off, _SUB), :] = cop_ref[pl.ds(src0 + off, _SUB), :]

    # ---- accumulate: acc[tt] += sum_{ttau} k[r*TL + ttau] * win[TL + tt - ttau] ----
    @pl.loop(0, nsub)
    def _tau_chunk(j):
        kt0 = pl.multiple_of(j * _SUB, _SUB)
        # Hoisted, sublane-broadcast kernel rows of this 8-tau chunk (one row load each),
        # reused across every output sub-tile below.
        kb = [jnp.broadcast_to(k_ref[pl.ds(kt0 + q, 1), :].astype(jnp.float32), (_SUB, TC))
              for q in range(_SUB)]

        @pl.loop(0, nsub)
        def _out_tile(t, kb=kb, kt0=kt0):
            tt0 = pl.multiple_of(t * _SUB, _SUB)
            base = pl.multiple_of(TL + tt0 - kt0, _SUB)     # in [8, 2*TL - 8], aligned
            # aligned 8-row loads from the phase-q shifted windows
            prod = [kb[q] * cop_ref[pl.ds(pl.multiple_of(base + q * W, _SUB), _SUB), :]
                    for q in range(_SUB)]
            # tree-sum keeps the add dependence chain short (mul + 3 adds + acc add)
            while len(prod) > 1:
                prod = [prod[a] + prod[a + 1] for a in range(0, len(prod), 2)]
            acc_ref[pl.ds(tt0, _SUB), :] = acc_ref[pl.ds(tt0, _SUB), :] + prod[0]

    # ---- writeback at the last tau-block of this output block (the diagonal) ----
    @pl.when(r == i)
    def _store():
        y_ref[...] = acc_ref[...].astype(y_ref.dtype)


def rtf_conv_pallas(u, k, *, time_block=None):
    """Causal depthwise conv  y[b,t,d] = sum_tau k[d,tau] * u[b,t-tau,d].

    u: (B, L, D), k: (D, L)  ->  y: (B, L, D)
    """
    B, L, D = u.shape
    assert k.shape == (D, L)
    C = B * D

    # Lane-dense layout: fold (B, D) onto lanes; pad lanes to a multiple of 128.
    C_pad = _round_up(C, 128)
    TC = 256 if C_pad % 256 == 0 else 128

    TL = time_block if time_block is not None else min(512, _round_up(L, _SUB))
    assert TL % _SUB == 0 and TL >= _SUB
    L_pad = _round_up(L, TL)

    # 'B L D -> L (B D)'; kernel broadcast over batch along the lane axis.
    u2 = jnp.transpose(u, (1, 0, 2)).reshape(L, C)
    k2 = jnp.tile(k.T.astype(jnp.float32), (1, B))                    # (L, C)
    u2 = jnp.pad(u2, ((0, L_pad - L), (0, C_pad - C)))
    k2 = jnp.pad(k2, ((0, L_pad - L), (0, C_pad - C)))

    n_c = C_pad // TC
    n_t = L_pad // TL

    # Flat triangular schedule: only the r <= i block pairs are visited (no predicated-off
    # grid steps, no dead k-block DMA).  Within each i the r axis is ascending, so the
    # diagonal (r == i) is the last step of the group -> init @ r==0, store @ r==i.
    pairs = [(ii, rr) for ii in range(n_t) for rr in range(ii + 1)]
    i_tbl = jnp.asarray([p[0] for p in pairs], dtype=jnp.int32)
    r_tbl = jnp.asarray([p[1] for p in pairs], dtype=jnp.int32)
    n_s = len(pairs)

    elt = jnp.dtype(u.dtype).itemsize

    y2 = pl.pallas_call(
        _rtf_conv_kernel,
        out_shape=jax.ShapeDtypeStruct((L_pad, C_pad), u.dtype),
        grid_spec=pltpu.PrefetchScalarGridSpec(
            num_scalar_prefetch=2,
            grid=(n_c, n_s),
            in_specs=[
                pl.BlockSpec((TL, TC), lambda c, s, it, rt: (rt[s], c)),                   # k
                pl.BlockSpec((TL, TC),
                             lambda c, s, it, rt: (jnp.maximum(it[s] - rt[s] - 1, 0), c)),  # u prev
                pl.BlockSpec((TL, TC), lambda c, s, it, rt: (it[s] - rt[s], c)),            # u cur
            ],
            out_specs=pl.BlockSpec((TL, TC), lambda c, s, it, rt: (it[s], c)),
            scratch_shapes=[
                pltpu.VMEM((TL, TC), jnp.float32),                 # resident f32 accumulator
                pltpu.VMEM((_SUB * 2 * TL, TC), jnp.float32),      # 8 phase-shifted windows
            ],
        ),
        compiler_params=pltpu.CompilerParams(
            dimension_semantics=("parallel", "arbitrary"),
            vmem_limit_bytes=48 * 1024 * 1024),
        cost_estimate=pl.CostEstimate(
            flops=int(2 * n_s * TL * TL * C_pad),                      # mul + add, live steps only
            transcendentals=0,
            bytes_accessed=int(n_s * TL * C_pad * (4 + 2 * elt) + 2 * L_pad * C_pad * elt)),
    )(i_tbl, r_tbl, k2, u2, u2)

    y2 = y2[:L, :C]
    return jnp.transpose(y2.reshape(L, B, D), (1, 0, 2))


# ----------------------------------------------------------------------------
# XLA FFT path (mirrors the PyTorch forward); used as long-L fallback and as reference.
# ----------------------------------------------------------------------------
def _fft_causal_depthwise_conv(u, k):
    B, l, D = u.shape
    n = 2 * l - l % 2
    u2 = jnp.transpose(u, (1, 0, 2)).reshape(l, B * D)                # 'B L D -> L (B D)'
    KU = jnp.fft.rfft(jnp.concatenate([k.T, u2], axis=1), n=n, axis=0)
    Kf = KU[:, :D]
    Uf = jnp.transpose(KU[:, D:].reshape(-1, B, D), (1, 0, 2))        # 'L (B D) -> B L D'
    y = jnp.fft.irfft(Kf[None] * Uf, n=n, axis=-2)[:, :l]
    return y.astype(u.dtype)


def rtf_forward(u, ab, h_0, d_model, num_a, state_size, trunc_len,
                *, pallas_max_len=4096, time_block=None):
    """RTF.forward (causal, no dropout): u (B, L, D) -> y (B, L, D)."""
    l = u.shape[-2]
    k = rtf_get_k(ab, h_0, d_model, num_a, state_size, trunc_len, l)   # (D, l)
    if l <= pallas_max_len:
        return rtf_conv_pallas(u, k, time_block=time_block)
    # Direct conv is O(L^2); for long sequences the FFT form is asymptotically better.
    # (On v7x the crossover is earlier, ~512-1024; tune pallas_max_len per generation.)
    return _fft_causal_depthwise_conv(u, k)


def rtf_forward_ref(u, ab, h_0, d_model, num_a, state_size, trunc_len):
    k = rtf_get_k(ab, h_0, d_model, num_a, state_size, trunc_len, u.shape[-2])
    return _fft_causal_depthwise_conv(u, k)


if __name__ == "__main__":
    def _run_case(batch, seq_len, d_model, state_size, trunc_len, num_a, seed, time_block=None):
        k_ab, k_h0, k_u = jax.random.split(jax.random.PRNGKey(seed), 3)
        ab = 0.1 * jax.random.normal(k_ab, (d_model + num_a, state_size), dtype=jnp.float32)
        h_0 = jax.random.normal(k_h0, (d_model,), dtype=jnp.float32)
        u = jax.random.normal(k_u, (batch, seq_len, d_model), dtype=jnp.float32)
        y = jax.block_until_ready(
            rtf_forward(u, ab, h_0, d_model, num_a, state_size, trunc_len,
                        time_block=time_block))
        y_ref = rtf_forward_ref(u, ab, h_0, d_model, num_a, state_size, trunc_len)
        np.testing.assert_allclose(np.asarray(y), np.asarray(y_ref), rtol=2e-3, atol=2e-3)

    # Case 1: small shapes consistent with the module (u is (batch, length, channels)).
    _run_case(batch=2, seq_len=16, d_model=4, state_size=4, trunc_len=16, num_a=4, seed=0)

    # Case 2: ragged L + multi-block triangular schedule (n_t=3, 6 live steps), shared
    # denominators (num_a < d_model), lane-padding path.
    _run_case(batch=2, seq_len=40, d_model=6, state_size=4, trunc_len=64, num_a=3, seed=1,
              time_block=16)

    # Case 3: wide folded lane dim (B*D = 144 -> C_pad = 256) exercising the TC=256 tile.
    _run_case(batch=3, seq_len=40, d_model=48, state_size=4, trunc_len=64, num_a=6, seed=2,
              time_block=16)

    print("KERNEL_OK")
</pallas_src>

<mosaic_0001>
module attributes {stable_mosaic.version = 11 : i64} {
  func.func @_rtf_conv_kernel(%arg0: i32, %arg1: i32, %arg2: memref<1xi32, #tpu.memory_space<smem>>, %arg3: memref<1xi32, #tpu.memory_space<smem>>, %arg4: memref<16x128xf32, #tpu.memory_space<vmem>>, %arg5: memref<16x128xf32, #tpu.memory_space<vmem>>, %arg6: memref<16x128xf32, #tpu.memory_space<vmem>>, %arg7: memref<16x128xf32, #tpu.memory_space<vmem>>, %arg8: memref<16x128xf32, #tpu.memory_space<vmem>>, %arg9: memref<256x128xf32, #tpu.memory_space<vmem>>) attributes {dimension_semantics = [#tpu.dimension_semantics<parallel>, #tpu.dimension_semantics<arbitrary>], iteration_bounds = array<i64: 1, 1>, scalar_prefetch = 2 : i64, scratch_operands = 2 : i64, tpu.core_type = #tpu.core_type<tc>, window_params = [{transform_indices = @transform_0, window_bounds = array<i64: 16, 128>}, {transform_indices = @transform_1, window_bounds = array<i64: 16, 128>}, {transform_indices = @transform_2, window_bounds = array<i64: 16, 128>}, {transform_indices = @transform_3, window_bounds = array<i64: 16, 128>}]} {
    %0 = arith.index_cast %arg1 : i32 to index
    %1 = memref.load %arg2[%0] : memref<1xi32, #tpu.memory_space<smem>>
    %2 = arith.index_cast %arg1 : i32 to index
    %3 = memref.load %arg3[%2] : memref<1xi32, #tpu.memory_space<smem>>
    %c0_i32 = arith.constant 0 : i32
    %4 = arith.cmpi eq, %3, %c0_i32 : i32
    %5 = arith.extui %4 : i1 to i32
    %c0_i32_0 = arith.constant 0 : i32
    %6 = arith.cmpi ne, %5, %c0_i32_0 : i32
    scf.if %6 {
      %cst = arith.constant 0.000000e+00 : f32
      %61 = vector.broadcast %cst : f32 to vector<16x128xf32>
      %c0_50 = arith.constant 0 : index
      %c0_51 = arith.constant 0 : index
      %62 = vector.load %arg8[%c0_50, %c0_51] : memref<16x128xf32, #tpu.memory_space<vmem>>, vector<16x128xf32>
      tpu.vector_store %arg8[%c0_50, %c0_51], %61 {strides = array<i32>} : memref<16x128xf32, #tpu.memory_space<vmem>>, vector<16x128xf32>,
    } else {
    }
    %7 = arith.cmpi eq, %3, %1 : i32
    %8 = arith.extui %7 : i1 to i32
    %c0_i32_1 = arith.constant 0 : i32
    %9 = arith.cmpi ne, %8, %c0_i32_1 : i32
    scf.if %9 {
      %cst = arith.constant 0.000000e+00 : f32
      %61 = vector.broadcast %cst : f32 to vector<16x128xf32>
      %c0_50 = arith.constant 0 : index
      %c0_51 = arith.constant 0 : index
      %62 = vector.load %arg9[%c0_50, %c0_51] : memref<256x128xf32, #tpu.memory_space<vmem>>, vector<16x128xf32>
      tpu.vector_store %arg9[%c0_50, %c0_51], %61 {strides = array<i32>} : memref<256x128xf32, #tpu.memory_space<vmem>>, vector<16x128xf32>,
    } else {
    }
    %10 = arith.cmpi slt, %3, %1 : i32
    %11 = arith.extui %10 : i1 to i32
    %c0_i32_2 = arith.constant 0 : i32
    %12 = arith.cmpi ne, %11, %c0_i32_2 : i32
    scf.if %12 {
      %c0_50 = arith.constant 0 : index
      %c0_51 = arith.constant 0 : index
      %61 = vector.load %arg5[%c0_50, %c0_51] : memref<16x128xf32, #tpu.memory_space<vmem>>, vector<16x128xf32>
      %c0_52 = arith.constant 0 : index
      %c0_53 = arith.constant 0 : index
      %62 = vector.load %arg9[%c0_52, %c0_53] : memref<256x128xf32, #tpu.memory_space<vmem>>, vector<16x128xf32>
      tpu.vector_store %arg9[%c0_52, %c0_53], %61 {strides = array<i32>} : memref<256x128xf32, #tpu.memory_space<vmem>>, vector<16x128xf32>,
    } else {
    }
    %c0 = arith.constant 0 : index
    %c0_3 = arith.constant 0 : index
    %13 = vector.load %arg6[%c0, %c0_3] : memref<16x128xf32, #tpu.memory_space<vmem>>, vector<16x128xf32>
    %c16 = arith.constant 16 : index
    %c0_4 = arith.constant 0 : index
    %14 = vector.load %arg9[%c16, %c0_4] : memref<256x128xf32, #tpu.memory_space<vmem>>, vector<16x128xf32>
    tpu.vector_store %arg9[%c16, %c0_4], %13 {strides = array<i32>} : memref<256x128xf32, #tpu.memory_space<vmem>>, vector<16x128xf32>,
    %c7 = arith.constant 7 : index
    %c0_5 = arith.constant 0 : index
    %15 = vector.load %arg9[%c7, %c0_5] : memref<256x128xf32, #tpu.memory_space<vmem>>, vector<8x128xf32>
    %c40 = arith.constant 40 : index
    %c0_6 = arith.constant 0 : index
    %16 = vector.load %arg9[%c40, %c0_6] : memref<256x128xf32, #tpu.memory_space<vmem>>, vector<8x128xf32>
    tpu.vector_store %arg9[%c40, %c0_6], %15 {strides = array<i32>} : memref<256x128xf32, #tpu.memory_space<vmem>>, vector<8x128xf32>,
    %c15 = arith.constant 15 : index
    %c0_7 = arith.constant 0 : index
    %17 = vector.load %arg9[%c15, %c0_7] : memref<256x128xf32, #tpu.memory_space<vmem>>, vector<8x128xf32>
    %c48 = arith.constant 48 : index
    %c0_8 = arith.constant 0 : index
    %18 = vector.load %arg9[%c48, %c0_8] : memref<256x128xf32, #tpu.memory_space<vmem>>, vector<8x128xf32>
    tpu.vector_store %arg9[%c48, %c0_8], %17 {strides = array<i32>} : memref<256x128xf32, #tpu.memory_space<vmem>>, vector<8x128xf32>,
    %c23 = arith.constant 23 : index
    %c0_9 = arith.constant 0 : index
    %19 = vector.load %arg9[%c23, %c0_9] : memref<256x128xf32, #tpu.memory_space<vmem>>, vector<8x128xf32>
    %c56 = arith.constant 56 : index
    %c0_10 = arith.constant 0 : index
    %20 = vector.load %arg9[%c56, %c0_10] : memref<256x128xf32, #tpu.memory_space<vmem>>, vector<8x128xf32>
    tpu.vector_store %arg9[%c56, %c0_10], %19 {strides = array<i32>} : memref<256x128xf32, #tpu.memory_space<vmem>>, vector<8x128xf32>,
    %c6 = arith.constant 6 : index
    %c0_11 = arith.constant 0 : index
    %21 = vector.load %arg9[%c6, %c0_11] : memref<256x128xf32, #tpu.memory_space<vmem>>, vector<8x128xf32>
    %c72 = arith.constant 72 : index
    %c0_12 = arith.constant 0 : index
    %22 = vector.load %arg9[%c72, %c0_12] : memref<256x128xf32, #tpu.memory_space<vmem>>, vector<8x128xf32>
    tpu.vector_store %arg9[%c72, %c0_12], %21 {strides = array<i32>} : memref<256x128xf32, #tpu.memory_space<vmem>>, vector<8x128xf32>,
    %c14 = arith.constant 14 : index
    %c0_13 = arith.constant 0 : index
    %23 = vector.load %arg9[%c14, %c0_13] : memref<256x128xf32, #tpu.memory_space<vmem>>, vector<8x128xf32>
    %c80 = arith.constant 80 : index
    %c0_14 = arith.constant 0 : index
    %24 = vector.load %arg9[%c80, %c0_14] : memref<256x128xf32, #tpu.memory_space<vmem>>, vector<8x128xf32>
    tpu.vector_store %arg9[%c80, %c0_14], %23 {strides = array<i32>} : memref<256x128xf32, #tpu.memory_space<vmem>>, vector<8x128xf32>,
    %c22 = arith.constant 22 : index
    %c0_15 = arith.constant 0 : index
    %25 = vector.load %arg9[%c22, %c0_15] : memref<256x128xf32, #tpu.memory_space<vmem>>, vector<8x128xf32>
    %c88 = arith.constant 88 : index
    %c0_16 = arith.constant 0 : index
    %26 = vector.load %arg9[%c88, %c0_16] : memref<256x128xf32, #tpu.memory_space<vmem>>, vector<8x128xf32>
    tpu.vector_store %arg9[%c88, %c0_16], %25 {strides = array<i32>} : memref<256x128xf32, #tpu.memory_space<vmem>>, vector<8x128xf32>,
    %c5 = arith.constant 5 : index
    %c0_17 = arith.constant 0 : index
    %27 = vector.load %arg9[%c5, %c0_17] : memref<256x128xf32, #tpu.memory_space<vmem>>, vector<8x128xf32>
    %c104 = arith.constant 104 : index
    %c0_18 = arith.constant 0 : index
    %28 = vector.load %arg9[%c104, %c0_18] : memref<256x128xf32, #tpu.memory_space<vmem>>, vector<8x128xf32>
    tpu.vector_store %arg9[%c104, %c0_18], %27 {strides = array<i32>} : memref<256x128xf32, #tpu.memory_space<vmem>>, vector<8x128xf32>,
    %c13 = arith.constant 13 : index
    %c0_19 = arith.constant 0 : index
    %29 = vector.load %arg9[%c13, %c0_19] : memref<256x128xf32, #tpu.memory_space<vmem>>, vector<8x128xf32>
    %c112 = arith.constant 112 : index
    %c0_20 = arith.constant 0 : index
    %30 = vector.load %arg9[%c112, %c0_20] : memref<256x128xf32, #tpu.memory_space<vmem>>, vector<8x128xf32>
    tpu.vector_store %arg9[%c112, %c0_20], %29 {strides = array<i32>} : memref<256x128xf32, #tpu.memory_space<vmem>>, vector<8x128xf32>,
    %c21 = arith.constant 21 : index
    %c0_21 = arith.constant 0 : index
    %31 = vector.load %arg9[%c21, %c0_21] : memref<256x128xf32, #tpu.memory_space<vmem>>, vector<8x128xf32>
    %c120 = arith.constant 120 : index
    %c0_22 = arith.constant 0 : index
    %32 = vector.load %arg9[%c120, %c0_22] : memref<256x128xf32, #tpu.memory_space<vmem>>, vector<8x128xf32>
    tpu.vector_store %arg9[%c120, %c0_22], %31 {strides = array<i32>} : memref<256x128xf32, #tpu.memory_space<vmem>>, vector<8x128xf32>,
    %c4 = arith.constant 4 : index
    %c0_23 = arith.constant 0 : index
    %33 = vector.load %arg9[%c4, %c0_23] : memref<256x128xf32, #tpu.memory_space<vmem>>, vector<8x128xf32>
    %c136 = arith.constant 136 : index
    %c0_24 = arith.constant 0 : index
    %34 = vector.load %arg9[%c136, %c0_24] : memref<256x128xf32, #tpu.memory_space<vmem>>, vector<8x128xf32>
    tpu.vector_store %arg9[%c136, %c0_24], %33 {strides = array<i32>} : memref<256x128xf32, #tpu.memory_space<vmem>>, vector<8x128xf32>,
    %c12 = arith.constant 12 : index
    %c0_25 = arith.constant 0 : index
    %35 = vector.load %arg9[%c12, %c0_25] : memref<256x128xf32, #tpu.memory_space<vmem>>, vector<8x128xf32>
    %c144 = arith.constant 144 : index
    %c0_26 = arith.constant 0 : index
    %36 = vector.load %arg9[%c144, %c0_26] : memref<256x128xf32, #tpu.memory_space<vmem>>, vector<8x128xf32>
    tpu.vector_store %arg9[%c144, %c0_26], %35 {strides = array<i32>} : memref<256x128xf32, #tpu.memory_space<vmem>>, vector<8x128xf32>,
    %c20 = arith.constant 20 : index
    %c0_27 = arith.constant 0 : index
    %37 = vector.load %arg9[%c20, %c0_27] : memref<256x128xf32, #tpu.memory_space<vmem>>, vector<8x128xf32>
    %c152 = arith.constant 152 : index
    %c0_28 = arith.constant 0 : index
    %38 = vector.load %arg9[%c152, %c0_28] : memref<256x128xf32, #tpu.memory_space<vmem>>, vector<8x128xf32>
    tpu.vector_store %arg9[%c152, %c0_28], %37 {strides = array<i32>} : memref<256x128xf32, #tpu.memory_space<vmem>>, vector<8x128xf32>,
    %c3 = arith.constant 3 : index
    %c0_29 = arith.constant 0 : index
    %39 = vector.load %arg9[%c3, %c0_29] : memref<256x128xf32, #tpu.memory_space<vmem>>, vector<8x128xf32>
    %c168 = arith.constant 168 : index
    %c0_30 = arith.constant 0 : index
    %40 = vector.load %arg9[%c168, %c0_30] : memref<256x128xf32, #tpu.memory_space<vmem>>, vector<8x128xf32>
    tpu.vector_store %arg9[%c168, %c0_30], %39 {strides = array<i32>} : memref<256x128xf32, #tpu.memory_space<vmem>>, vector<8x128xf32>,
    %c11 = arith.constant 11 : index
    %c0_31 = arith.constant 0 : index
    %41 = vector.load %arg9[%c11, %c0_31] : memref<256x128xf32, #tpu.memory_space<vmem>>, vector<8x128xf32>
    %c176 = arith.constant 176 : index
    %c0_32 = arith.constant 0 : index
    %42 = vector.load %arg9[%c176, %c0_32] : memref<256x128xf32, #tpu.memory_space<vmem>>, vector<8x128xf32>
    tpu.vector_store %arg9[%c176, %c0_32], %41 {strides = array<i32>} : memref<256x128xf32, #tpu.memory_space<vmem>>, vector<8x128xf32>,
    %c19 = arith.constant 19 : index
    %c0_33 = arith.constant 0 : index
    %43 = vector.load %arg9[%c19, %c0_33] : memref<256x128xf32, #tpu.memory_space<vmem>>, vector<8x128xf32>
    %c184 = arith.constant 184 : index
    %c0_34 = arith.constant 0 : index
    %44 = vector.load %arg9[%c184, %c0_34] : memref<256x128xf32, #tpu.memory_space<vmem>>, vector<8x128xf32>
    tpu.vector_store %arg9[%c184, %c0_34], %43 {strides = array<i32>} : memref<256x128xf32, #tpu.memory_space<vmem>>, vector<8x128xf32>,
    %c2 = arith.constant 2 : index
    %c0_35 = arith.constant 0 : index
    %45 = vector.load %arg9[%c2, %c0_35] : memref<256x128xf32, #tpu.memory_space<vmem>>, vector<8x128xf32>
    %c200 = arith.constant 200 : index
    %c0_36 = arith.constant 0 : index
    %46 = vector.load %arg9[%c200, %c0_36] : memref<256x128xf32, #tpu.memory_space<vmem>>, vector<8x128xf32>
    tpu.vector_store %arg9[%c200, %c0_36], %45 {strides = array<i32>} : memref<256x128xf32, #tpu.memory_space<vmem>>, vector<8x128xf32>,
    %c10 = arith.constant 10 : index
    %c0_37 = arith.constant 0 : index
    %47 = vector.load %arg9[%c10, %c0_37] : memref<256x128xf32, #tpu.memory_space<vmem>>, vector<8x128xf32>
    %c208 = arith.constant 208 : index
    %c0_38 = arith.constant 0 : index
    %48 = vector.load %arg9[%c208, %c0_38] : memref<256x128xf32, #tpu.memory_space<vmem>>, vector<8x128xf32>
    tpu.vector_store %arg9[%c208, %c0_38], %47 {strides = array<i32>} : memref<256x128xf32, #tpu.memory_space<vmem>>, vector<8x128xf32>,
    %c18 = arith.constant 18 : index
    %c0_39 = arith.constant 0 : index
    %49 = vector.load %arg9[%c18, %c0_39] : memref<256x128xf32, #tpu.memory_space<vmem>>, vector<8x128xf32>
    %c216 = arith.constant 216 : index
    %c0_40 = arith.constant 0 : index
    %50 = vector.load %arg9[%c216, %c0_40] : memref<256x128xf32, #tpu.memory_space<vmem>>, vector<8x128xf32>
    tpu.vector_store %arg9[%c216, %c0_40], %49 {strides = array<i32>} : memref<256x128xf32, #tpu.memory_space<vmem>>, vector<8x128xf32>,
    %c1 = arith.constant 1 : index
    %c0_41 = arith.constant 0 : index
    %51 = vector.load %arg9[%c1, %c0_41] : memref<256x128xf32, #tpu.memory_space<vmem>>, vector<8x128xf32>
    %c232 = arith.constant 232 : index
    %c0_42 = arith.constant 0 : index
    %52 = vector.load %arg9[%c232, %c0_42] : memref<256x128xf32, #tpu.memory_space<vmem>>, vector<8x128xf32>
    tpu.vector_store %arg9[%c232, %c0_42], %51 {strides = array<i32>} : memref<256x128xf32, #tpu.memory_space<vmem>>, vector<8x128xf32>,
    %c9 = arith.constant 9 : index
    %c0_43 = arith.constant 0 : index
    %53 = vector.load %arg9[%c9, %c0_43] : memref<256x128xf32, #tpu.memory_space<vmem>>, vector<8x128xf32>
    %c240 = arith.constant 240 : index
    %c0_44 = arith.constant 0 : index
    %54 = vector.load %arg9[%c240, %c0_44] : memref<256x128xf32, #tpu.memory_space<vmem>>, vector<8x128xf32>
    tpu.vector_store %arg9[%c240, %c0_44], %53 {strides = array<i32>} : memref<256x128xf32, #tpu.memory_space<vmem>>, vector<8x128xf32>,
    %c17 = arith.constant 17 : index
    %c0_45 = arith.constant 0 : index
    %55 = vector.load %arg9[%c17, %c0_45] : memref<256x128xf32, #tpu.memory_space<vmem>>, vector<8x128xf32>
    %c248 = arith.constant 248 : index
    %c0_46 = arith.constant 0 : index
    %56 = vector.load %arg9[%c248, %c0_46] : memref<256x128xf32, #tpu.memory_space<vmem>>, vector<8x128xf32>
    tpu.vector_store %arg9[%c248, %c0_46], %55 {strides = array<i32>} : memref<256x128xf32, #tpu.memory_space<vmem>>, vector<8x128xf32>,
    %c0_i32_47 = arith.constant 0 : i32
    %c2_i32 = arith.constant 2 : i32
    %57 = arith.addi %c0_i32_47, %c2_i32 : i32
    %c1_i32 = arith.constant 1 : i32
    scf.for %arg10 = %c0_i32_47 to %57 step %c1_i32  : i32 {
      %c1_i32_50 = arith.constant 1 : i32
      %61 = arith.muli %arg10, %c1_i32_50 : i32
      %c0_i32_51 = arith.constant 0 : i32
      %62 = arith.addi %c0_i32_51, %61 : i32
      %c8_i32 = arith.constant 8 : i32
      %63 = arith.muli %62, %c8_i32 : i32
      %64 = tpu.assume_multiple %63, 8 : i32
      %c0_i32_52 = arith.constant 0 : i32
      %65 = arith.addi %64, %c0_i32_52 : i32
      %66 = arith.index_cast %65 : i32 to index
      %c0_53 = arith.constant 0 : index
      %67 = vector.load %arg4[%66, %c0_53] : memref<16x128xf32, #tpu.memory_space<vmem>>, vector<1x128xf32>
      %68 = vector.shape_cast %67 : vector<1x128xf32> to vector<1x128xf32>
      %69 = vector.broadcast %68 : vector<1x128xf32> to vector<8x128xf32>
      %c1_i32_54 = arith.constant 1 : i32
      %70 = arith.addi %64, %c1_i32_54 : i32
      %71 = arith.index_cast %70 : i32 to index
      %c0_55 = arith.constant 0 : index
      %72 = vector.load %arg4[%71, %c0_55] : memref<16x128xf32, #tpu.memory_space<vmem>>, vector<1x128xf32>
      %73 = vector.shape_cast %72 : vector<1x128xf32> to vector<1x128xf32>
      %74 = vector.broadcast %73 : vector<1x128xf32> to vector<8x128xf32>
      %c2_i32_56 = arith.constant 2 : i32
      %75 = arith.addi %64, %c2_i32_56 : i32
      %76 = arith.index_cast %75 : i32 to index
      %c0_57 = arith.constant 0 : index
      %77 = vector.load %arg4[%76, %c0_57] : memref<16x128xf32, #tpu.memory_space<vmem>>, vector<1x128xf32>
      %78 = vector.shape_cast %77 : vector<1x128xf32> to vector<1x128xf32>
      %79 = vector.broadcast %78 : vector<1x128xf32> to vector<8x128xf32>
      %c3_i32 = arith.constant 3 : i32
      %80 = arith.addi %64, %c3_i32 : i32
      %81 = arith.index_cast %80 : i32 to index
      %c0_58 = arith.constant 0 : index
      %82 = vector.load %arg4[%81, %c0_58] : memref<16x128xf32, #tpu.memory_space<vmem>>, vector<1x128xf32>
      %83 = vector.shape_cast %82 : vector<1x128xf32> to vector<1x128xf32>
      %84 = vector.broadcast %83 : vector<1x128xf32> to vector<8x128xf32>
      %c4_i32 = arith.constant 4 : i32
      %85 = arith.addi %64, %c4_i32 : i32
      %86 = arith.index_cast %85 : i32 to index
      %c0_59 = arith.constant 0 : index
      %87 = vector.load %arg4[%86, %c0_59] : memref<16x128xf32, #tpu.memory_space<vmem>>, vector<1x128xf32>
      %88 = vector.shape_cast %87 : vector<1x128xf32> to vector<1x128xf32>
      %89 = vector.broadcast %88 : vector<1x128xf32> to vector<8x128xf32>
      %c5_i32 = arith.constant 5 : i32
      %90 = arith.addi %64, %c5_i32 : i32
      %91 = arith.index_cast %90 : i32 to index
      %c0_60 = arith.constant 0 : index
      %92 = vector.load %arg4[%91, %c0_60] : memref<16x128xf32, #tpu.memory_space<vmem>>, vector<1x128xf32>
      %93 = vector.shape_cast %92 : vector<1x128xf32> to vector<1x128xf32>
      %94 = vector.broadcast %93 : vector<1x128xf32> to vector<8x128xf32>
      %c6_i32 = arith.constant 6 : i32
      %95 = arith.addi %64, %c6_i32 : i32
      %96 = arith.index_cast %95 : i32 to index
      %c0_61 = arith.constant 0 : index
      %97 = vector.load %arg4[%96, %c0_61] : memref<16x128xf32, #tpu.memory_space<vmem>>, vector<1x128xf32>
      %98 = vector.shape_cast %97 : vector<1x128xf32> to vector<1x128xf32>
      %99 = vector.broadcast %98 : vector<1x128xf32> to vector<8x128xf32>
      %c7_i32 = arith.constant 7 : i32
      %100 = arith.addi %64, %c7_i32 : i32
      %101 = arith.index_cast %100 : i32 to index
      %c0_62 = arith.constant 0 : index
      %102 = vector.load %arg4[%101, %c0_62] : memref<16x128xf32, #tpu.memory_space<vmem>>, vector<1x128xf32>
      %103 = vector.shape_cast %102 : vector<1x128xf32> to vector<1x128xf32>
      %104 = vector.broadcast %103 : vector<1x128xf32> to vector<8x128xf32>
      %c0_i32_63 = arith.constant 0 : i32
      %c2_i32_64 = arith.constant 2 : i32
      %105 = arith.addi %c0_i32_63, %c2_i32_64 : i32
      %c1_i32_65 = arith.constant 1 : i32
      scf.for %arg11 = %c0_i32_63 to %105 step %c1_i32_65  : i32 {
        %c1_i32_67 = arith.constant 1 : i32
        %106 = arith.muli %arg11, %c1_i32_67 : i32
        %c0_i32_68 = arith.constant 0 : i32
        %107 = arith.addi %c0_i32_68, %106 : i32
        %c8_i32_69 = arith.constant 8 : i32
        %108 = arith.muli %107, %c8_i32_69 : i32
        %109 = tpu.assume_multiple %108, 8 : i32
        %c16_i32 = arith.constant 16 : i32
        %110 = arith.addi %c16_i32, %109 : i32
        %111 = arith.subi %110, %64 : i32
        %112 = tpu.assume_multiple %111, 8 : i32
        %c0_i32_70 = arith.constant 0 : i32
        %113 = arith.addi %112, %c0_i32_70 : i32
        %114 = tpu.assume_multiple %113, 8 : i32
        %115 = arith.index_cast %114 : i32 to index
        %c0_71 = arith.constant 0 : index
        %116 = vector.load %arg9[%115, %c0_71] : memref<256x128xf32, #tpu.memory_space<vmem>>, vector<8x128xf32>
        %117 = arith.mulf %69, %116 : vector<8x128xf32>
        %c32_i32 = arith.constant 32 : i32
        %118 = arith.addi %112, %c32_i32 : i32
        %119 = tpu.assume_multiple %118, 8 : i32
        %120 = arith.index_cast %119 : i32 to index
        %c0_72 = arith.constant 0 : index
        %121 = vector.load %arg9[%120, %c0_72] : memref<256x128xf32, #tpu.memory_space<vmem>>, vector<8x128xf32>
        %122 = arith.mulf %74, %121 : vector<8x128xf32>
        %c64_i32 = arith.constant 64 : i32
        %123 = arith.addi %112, %c64_i32 : i32
        %124 = tpu.assume_multiple %123, 8 : i32
        %125 = arith.index_cast %124 : i32 to index
        %c0_73 = arith.constant 0 : index
        %126 = vector.load %arg9[%125, %c0_73] : memref<256x128xf32, #tpu.memory_space<vmem>>, vector<8x128xf32>
        %127 = arith.mulf %79, %126 : vector<8x128xf32>
        %c96_i32 = arith.constant 96 : i32
        %128 = arith.addi %112, %c96_i32 : i32
        %129 = tpu.assume_multiple %128, 8 : i32
        %130 = arith.index_cast %129 : i32 to index
        %c0_74 = arith.constant 0 : index
        %131 = vector.load %arg9[%130, %c0_74] : memref<256x128xf32, #tpu.memory_space<vmem>>, vector<8x128xf32>
        %132 = arith.mulf %84, %131 : vector<8x128xf32>
        %c128_i32 = arith.constant 128 : i32
        %133 = arith.addi %112, %c128_i32 : i32
        %134 = tpu.assume_multiple %133, 8 : i32
        %135 = arith.index_cast %134 : i32 to index
        %c0_75 = arith.constant 0 : index
        %136 = vector.load %arg9[%135, %c0_75] : memref<256x128xf32, #tpu.memory_space<vmem>>, vector<8x128xf32>
        %137 = arith.mulf %89, %136 : vector<8x128xf32>
        %c160_i32 = arith.constant 160 : i32
        %138 = arith.addi %112, %c160_i32 : i32
        %139 = tpu.assume_multiple %138, 8 : i32
        %140 = arith.index_cast %139 : i32 to index
        %c0_76 = arith.constant 0 : index
        %141 = vector.load %arg9[%140, %c0_76] : memref<256x128xf32, #tpu.memory_space<vmem>>, vector<8x128xf32>
        %142 = arith.mulf %94, %141 : vector<8x128xf32>
        %c192_i32 = arith.constant 192 : i32
        %143 = arith.addi %112, %c192_i32 : i32
        %144 = tpu.assume_multiple %143, 8 : i32
        %145 = arith.index_cast %144 : i32 to index
        %c0_77 = arith.constant 0 : index
        %146 = vector.load %arg9[%145, %c0_77] : memref<256x128xf32, #tpu.memory_space<vmem>>, vector<8x128xf32>
        %147 = arith.mulf %99, %146 : vector<8x128xf32>
        %c224_i32 = arith.constant 224 : i32
        %148 = arith.addi %112, %c224_i32 : i32
        %149 = tpu.assume_multiple %148, 8 : i32
        %150 = arith.index_cast %149 : i32 to index
        %c0_78 = arith.constant 0 : index
        %151 = vector.load %arg9[%150, %c0_78] : memref<256x128xf32, #tpu.memory_space<vmem>>, vector<8x128xf32>
        %152 = arith.mulf %104, %151 : vector<8x128xf32>
        %153 = arith.addf %117, %122 : vector<8x128xf32>
        %154 = arith.addf %127, %132 : vector<8x128xf32>
        %155 = arith.addf %137, %142 : vector<8x128xf32>
        %156 = arith.addf %147, %152 : vector<8x128xf32>
        %157 = arith.addf %153, %154 : vector<8x128xf32>
        %158 = arith.addf %155, %156 : vector<8x128xf32>
        %159 = arith.addf %157, %158 : vector<8x128xf32>
        %160 = arith.index_cast %109 : i32 to index
        %c0_79 = arith.constant 0 : index
        %161 = vector.load %arg8[%160, %c0_79] : memref<16x128xf32, #tpu.memory_space<vmem>>, vector<8x128xf32>
        %162 = arith.addf %161, %159 : vector<8x128xf32>
        %163 = arith.index_cast %109 : i32 to index
        %c0_80 = arith.constant 0 : index
        %164 = vector.load %arg8[%163, %c0_80] : memref<16x128xf32, #tpu.memory_space<vmem>>, vector<8x128xf32>
        tpu.vector_store %arg8[%163, %c0_80], %162 {strides = array<i32>} : memref<16x128xf32, #tpu.memory_space<vmem>>, vector<8x128xf32>,
      }
      %c2_i32_66 = arith.constant 2 : i32
    }
    %c2_i32_48 = arith.constant 2 : i32
    %58 = arith.cmpi eq, %3, %1 : i32
    %59 = arith.extui %58 : i1 to i32
    %c0_i32_49 = arith.constant 0 : i32
    %60 = arith.cmpi ne, %59, %c0_i32_49 : i32
    scf.if %60 {
      %c0_50 = arith.constant 0 : index
      %c0_51 = arith.constant 0 : index
      %61 = vector.load %arg8[%c0_50, %c0_51] : memref<16x128xf32, #tpu.memory_space<vmem>>, vector<16x128xf32>
      %c0_52 = arith.constant 0 : index
      %c0_53 = arith.constant 0 : index
      %62 = vector.load %arg7[%c0_52, %c0_53] : memref<16x128xf32, #tpu.memory_space<vmem>>, vector<16x128xf32>
      tpu.vector_store %arg7[%c0_52, %c0_53], %61 {strides = array<i32>} : memref<16x128xf32, #tpu.memory_space<vmem>>, vector<16x128xf32>,
    } else {
    }
    return
  }
  func.func @transform_0(%arg0: i32, %arg1: i32, %arg2: memref<1xi32, #tpu.memory_space<smem>>, %arg3: memref<1xi32, #tpu.memory_space<smem>>) -> (i32, i32) {
    %0 = arith.index_cast %arg1 : i32 to index
    %1 = memref.load %arg3[%0] : memref<1xi32, #tpu.memory_space<smem>>
    %c0_i32 = arith.constant 0 : i32
    return %1, %arg0 : i32, i32
  }
  func.func @transform_1(%arg0: i32, %arg1: i32, %arg2: memref<1xi32, #tpu.memory_space<smem>>, %arg3: memref<1xi32, #tpu.memory_space<smem>>) -> (i32, i32) {
    %0 = arith.index_cast %arg1 : i32 to index
    %1 = memref.load %arg2[%0] : memref<1xi32, #tpu.memory_space<smem>>
    %2 = arith.index_cast %arg1 : i32 to index
    %3 = memref.load %arg3[%2] : memref<1xi32, #tpu.memory_space<smem>>
    %4 = arith.subi %1, %3 : i32
    %c1_i32 = arith.constant 1 : i32
    %5 = arith.subi %4, %c1_i32 : i32
    %c0_i32 = arith.constant 0 : i32
    %6 = arith.maxsi %5, %c0_i32 : i32
    %c0_i32_0 = arith.constant 0 : i32
    return %6, %arg0 : i32, i32
  }
  func.func @transform_2(%arg0: i32, %arg1: i32, %arg2: memref<1xi32, #tpu.memory_space<smem>>, %arg3: memref<1xi32, #tpu.memory_space<smem>>) -> (i32, i32) {
    %0 = arith.index_cast %arg1 : i32 to index
    %1 = memref.load %arg2[%0] : memref<1xi32, #tpu.memory_space<smem>>
    %2 = arith.index_cast %arg1 : i32 to index
    %3 = memref.load %arg3[%2] : memref<1xi32, #tpu.memory_space<smem>>
    %4 = arith.subi %1, %3 : i32
    %c0_i32 = arith.constant 0 : i32
    return %4, %arg0 : i32, i32
  }
  func.func @transform_3(%arg0: i32, %arg1: i32, %arg2: memref<1xi32, #tpu.memory_space<smem>>, %arg3: memref<1xi32, #tpu.memory_space<smem>>) -> (i32, i32) {
    %0 = arith.index_cast %arg1 : i32 to index
    %1 = memref.load %arg2[%0] : memref<1xi32, #tpu.memory_space<smem>>
    %c0_i32 = arith.constant 0 : i32
    return %1, %arg0 : i32, i32
  }
}

</mosaic_0001>

<bundles_post_ra>
// kernel: tpu_custom_call.1
= control target key start
LH: loop header
LB: loop body
LE: loop exit
PB: predicated region body
PF: predicated region fallthrough
CT: control target
= control target key end

     0   :  { %s726_s0 = inlined_call_operand.<no memory space> [shape: s32[1], index: 0, kind: input, shape index: {}]   ;;  %s727_s1 = inlined_call_operand.<no memory space> [shape: s32[1], index: 1, kind: input, shape index: {}]   ;;  %s728_s2 = inlined_call_operand.hbm [shape: f32[16,128], index: 2, kind: input, shape index: {}]   ;;  %s729_s3 = inlined_call_operand.hbm [shape: f32[16,128], index: 3, kind: input, shape index: {}]   ;;  %s730_s4 = inlined_call_operand.hbm [shape: f32[16,128], index: 4, kind: input, shape index: {}]   ;;  %s731_s5 = inlined_call_operand.hbm [shape: f32[16,128], index: 5, kind: output, shape index: {}]  }
   0x1   :  { %10 = sst [smem:[#allocation5]] %s726_s0 }
   0x2   :  { %12 = vsyncpa [#allocation8], 0 }
   0x3   :  { %13 = vsyncpa [#allocation11], 0 }
   0x4   :  { %14 = vsyncpa [#allocation9], 0  ;;  %s33_s20 = sld [smem:[#allocation5]]  ;;  %s406_s23 = sshll.u32 %s727_s1, 8 }
   0x5   :  { %s552_s24 = smov [#allocation7]   ;;  %s553_s26 = smov [#allocation10]  }
   0x6   :  { %s24_s25 = sshll.u32 %s552_s24, 4  ;;  %s596_s27 = sshll.u32 %s553_s26, 4  ;;  %s25_s25 = int_to_ptr.vmem [resolvable:$true] %s24_s25  ;;  %s46_s27 = int_to_ptr.vmem [resolvable:$true] %s596_s27 }
   0x7   :  { %s601_s30 = scalar_lea.hbm %s728_s2, %s406_s23  ;;  %s554_s9 = smov [#allocation12]  }
   0x8   :  { %s63_s10 = sshll.u32 %s554_s9, 4  ;;  %s434_s13 = scalar_lea.hbm %s601_s30, 256  ;;  %s631_s10 = int_to_ptr.vmem [resolvable:$true] %s63_s10 }
   0x9   :  { %p435_p1 = scmp.ne.s32.totalorder %s601_s30, %s434_s13  ;;  %s436_s16 = scalar_lea.hbm %s728_s2, 256 }
   0xa   :  { %s606_s7 = ssub.s32 %s33_s20, %s727_s1  ;;  %p437_p2 = scmp.lt.u32.totalorder %s601_s30, %s728_s2 }
   0xb   :  { %s364_s8 = sadd.s32 4294967295, %s606_s7  ;;  %s408_s12 = sshll.u32 %s606_s7, 8 }
   0xc   :  { %p609_p0 = scmp.gt.s32.totalorder %s364_s8, 0  ;;  %p438_p3 = scmp.lt.u32.totalorder %s436_s16, %s434_s13 }
   0xd   :  { %p440_p5 = scmp.lt.u32.totalorder %s434_s13, %s601_s30 }
   0xe   :  { %p439_p4 = por %p438_p3, %p437_p2 }
  0x10   :  { %p441_p6 = por %p440_p5, %p439_p4 }
  0x12   :  { %p442_p7 = pnand %p441_p6, %p435_p1 }
  0x14   :  { %445 = shalt.err (!%p442_p7)
}
  0x15   :  { %s446_s19 = scalar_lea.vmem %s25_s25, 256  ;;  %p451_p9 = scmp.lt.s32.totalorder %s25_s25, %s25_s25 }
  0x16   :  { %p447_p8 = scmp.ne.s32.totalorder %s25_s25, %s446_s19  ;;  %p452_p10 = scmp.lt.s32.totalorder %s446_s19, %s446_s19 }
  0x18   :  { %p453_p11 = por %p452_p10, %p451_p9 }
  0x1a   :  { %p454_p12 = pnand %p453_p11, %p447_p8 }
  0x1c   :  { %457 = shalt.err (!%p454_p12)
}
  0x1d   :  { %s555_s20 = smov 128   ;;  %s556_s21 = smov 8  }
  0x1e   :  { %30 = dma.hbm_to_vmem [thread:$0]  %s601_s30, 256, %s25_s25, [#allocation8], %s555_s20, %s555_s20, %s556_s21  }
  0x1f   :  { %s734_s8 = smov (!%p609_p0, %s364_s8), 0  ;;  %s636_s24 = scalar_lea.hbm %s730_s4, %s408_s12 }
  0x20   :  { %s407_s2 = sshll.u32 %s734_s8, 8  ;;  %s460_s25 = scalar_lea.hbm %s729_s3, 256 }
  0x21   :  { %s44_s29 = scalar_lea.hbm %s729_s3, %s407_s2 }
  0x22   :  { %s458_s6 = scalar_lea.hbm %s44_s29, 256  ;;  %p461_p0 = scmp.lt.u32.totalorder %s44_s29, %s729_s3 }
  0x23   :  { %p459_p13 = scmp.ne.s32.totalorder %s44_s29, %s458_s6  ;;  %p462_p1 = scmp.lt.u32.totalorder %s460_s25, %s458_s6 }
  0x24   :  { %p464_p3 = scmp.lt.u32.totalorder %s458_s6, %s44_s29 }
  0x25   :  { %p463_p2 = por %p462_p1, %p461_p0 }
  0x27   :  { %p465_p4 = por %p464_p3, %p463_p2 }
  0x29   :  { %p466_p5 = pnand %p465_p4, %p459_p13 }
  0x2b   :  { %469 = shalt.err (!%p466_p5)
}
  0x2c   :  { %s470_s8 = scalar_lea.vmem %s46_s27, 256  ;;  %p475_p7 = scmp.lt.s32.totalorder %s46_s27, %s46_s27 }
  0x2d   :  { %p471_p6 = scmp.ne.s32.totalorder %s46_s27, %s470_s8  ;;  %p476_p8 = scmp.lt.s32.totalorder %s470_s8, %s470_s8 }
  0x2f   :  { %p477_p9 = por %p476_p8, %p475_p7 }
  0x31   :  { %p478_p10 = pnand %p477_p9, %p471_p6 }
  0x33   :  { %481 = shalt.err (!%p478_p10)
}
  0x34   :  { %51 = dma.hbm_to_vmem [thread:$0]  %s44_s29, 256, %s46_s27, [#allocation11], %s555_s20, %s555_s20, %s556_s21  }
  0x35   :  { %s482_s3 = scalar_lea.hbm %s636_s24, 256  ;;  %s484_s13 = scalar_lea.hbm %s730_s4, 256 }
  0x36   :  { %p483_p11 = scmp.ne.s32.totalorder %s636_s24, %s482_s3  ;;  %p485_p12 = scmp.lt.u32.totalorder %s636_s24, %s730_s4 }
  0x37   :  { %p486_p13 = scmp.lt.u32.totalorder %s484_s13, %s482_s3  ;;  %p488_p1 = scmp.lt.u32.totalorder %s482_s3, %s636_s24 }
  0x39   :  { %p487_p0 = por %p486_p13, %p485_p12 }
  0x3b   :  { %p489_p2 = por %p488_p1, %p487_p0 }
  0x3d   :  { %p490_p3 = pnand %p489_p2, %p483_p11 }
  0x3f   :  { %493 = shalt.err (!%p490_p3)
}
  0x40   :  { %s494_s27 = scalar_lea.vmem %s631_s10, 256  ;;  %p499_p5 = scmp.lt.s32.totalorder %s631_s10, %s631_s10 }
  0x41   :  { %p495_p4 = scmp.ne.s32.totalorder %s631_s10, %s494_s27  ;;  %p500_p6 = scmp.lt.s32.totalorder %s494_s27, %s494_s27 }
  0x43   :  { %p501_p7 = por %p500_p6, %p499_p5 }
  0x45   :  { %p502_p8 = pnand %p501_p7, %p495_p4 }
  0x47   :  { %505 = shalt.err (!%p502_p8)
}
  0x48   :  { %69 = dma.hbm_to_vmem [thread:$0]  %s636_s24, 256, %s631_s10, [#allocation11], %s555_s20, %s555_s20, %s556_s21  }
  0x49   :  { %538 = dma.done.wait [#allocation8], 256  }
  0x4a   :  { %539 = vsyncadd [#allocation8], 4294967040 }
  0x4b   :  { %540 = dma.done.wait [#allocation11], 512  }
  0x4c   :  { %541 = vsyncadd [#allocation11], 4294966784  ;;  %s669_s4 = sld [smem:[#allocation5]]  ;;  %p369_p9 = scmp.ne.s32.totalorder %s727_s1, 0 }
  0x4d   :  { %v557_v0 = vmov (!%p369_p9), 0.0  }
  0x4e   :  { %99 = sbr.rel (%p369_p9) target bundleno = 85 (0x55), region = 29  ;;  %100 = vst [vmem:[#allocation2] sm:$0xff] (!%p369_p9), %v557_v0  ;;  %101 = vst [vmem:[#allocation2 + $0x8] sm:$0xff] (!%p369_p9), %v557_v0 }
  0x55 PF:  { %p370_p10 = scmp.ne.s32.totalorder %s727_s1, %s669_s4 }
  0x56   :  { %v558_v1 = vmov (!%p370_p10), 0.0  }
  0x57   :  { %105 = sbr.rel (%p370_p10) target bundleno = 94 (0x5e), region = 33  ;;  %106 = vst [vmem:[#allocation3] sm:$0xff] (!%p370_p10), %v558_v1  ;;  %107 = vst [vmem:[#allocation3 + $0x8] sm:$0xff] (!%p370_p10), %v558_v1 }
  0x5e PF:  { %p371_p11 = scmp.ge.s32.totalorder %s727_s1, %s669_s4 }
  0x5f   :  { %v112_v2 = vld [vmem:[#allocation10] sm:$0xff] (!%p371_p11)  ;;  %v113_v3 = vld [vmem:[#allocation10 + $0x8] sm:$0xff] (!%p371_p11) }
  0x60   :  { %111 = sbr.rel (%p371_p11) target bundleno = 103 (0x67), region = 37  ;;  %114 = vst [vmem:[#allocation3] sm:$0xff] (!%p371_p11), %v112_v2  ;;  %115 = vst [vmem:[#allocation3 + $0x8] sm:$0xff] (!%p371_p11), %v113_v3 }
  0x67 PF:  { %v116_v4 = vld [vmem:[#allocation12] sm:$0xff]  ;;  %v117_v5 = vld [vmem:[#allocation12 + $0x8] sm:$0xff]  ;;  %s687_s24 = smov 0  }
  0x68   :  { %v120_v6 = vld [vmem:[#allocation3 + $0x7] sm:$0xff]  ;;  %118 = vst [vmem:[#allocation3 + $0x10] sm:$0xff] %v116_v4  ;;  %119 = vst [vmem:[#allocation3 + $0x18] sm:$0xff] %v117_v5 }
  0x69   :  { %121 = vst [vmem:[#allocation3 + $0x28] sm:$0xff] %v120_v6  ;;  %v126_v7 = vld [vmem:[#allocation3 + $0x6] sm:$0xff] }
  0x6a   :  { %v132_v8 = vld [vmem:[#allocation3 + $0x5] sm:$0xff]  ;;  %127 = vst [vmem:[#allocation3 + $0x48] sm:$0xff] %v126_v7 }
  0x6b   :  { %v138_v9 = vld [vmem:[#allocation3 + $0x4] sm:$0xff]  ;;  %133 = vst [vmem:[#allocation3 + $0x68] sm:$0xff] %v132_v8 }
  0x6c   :  { %139 = vst [vmem:[#allocation3 + $0x88] sm:$0xff] %v138_v9  ;;  %v144_v10 = vld [vmem:[#allocation3 + $0x3] sm:$0xff] }
  0x6d   :  { %v150_v11 = vld [vmem:[#allocation3 + $0x2] sm:$0xff]  ;;  %145 = vst [vmem:[#allocation3 + $0xa8] sm:$0xff] %v144_v10 }
  0x6e   :  { %v156_v12 = vld [vmem:[#allocation3 + $0x1] sm:$0xff]  ;;  %151 = vst [vmem:[#allocation3 + $0xc8] sm:$0xff] %v150_v11 }
  0x6f   :  { %157 = vst [vmem:[#allocation3 + $0xe8] sm:$0xff] %v156_v12  ;;  %v122_v13 = vld [vmem:[#allocation3 + $0xf] sm:$0xff]  ;;  %v124_v14 = vld [vmem:[#allocation3 + $0x17] sm:$0xff] }
  0x70   :  { %v128_v15 = vld [vmem:[#allocation3 + $0xe] sm:$0xff]  ;;  %123 = vst [vmem:[#allocation3 + $0x30] sm:$0xff] %v122_v13  ;;  %125 = vst [vmem:[#allocation3 + $0x38] sm:$0xff] %v124_v14  ;;  %v130_v16 = vld [vmem:[#allocation3 + $0x16] sm:$0xff] }
  0x71   :  { %129 = vst [vmem:[#allocation3 + $0x50] sm:$0xff] %v128_v15  ;;  %v134_v17 = vld [vmem:[#allocation3 + $0xd] sm:$0xff]  ;;  %v136_v18 = vld [vmem:[#allocation3 + $0x15] sm:$0xff]  ;;  %131 = vst [vmem:[#allocation3 + $0x58] sm:$0xff] %v130_v16 }
  0x72   :  { %135 = vst [vmem:[#allocation3 + $0x70] sm:$0xff] %v134_v17  ;;  %137 = vst [vmem:[#allocation3 + $0x78] sm:$0xff] %v136_v18  ;;  %v140_v19 = vld [vmem:[#allocation3 + $0xc] sm:$0xff]  ;;  %v142_v20 = vld [vmem:[#allocation3 + $0x14] sm:$0xff] }
  0x73   :  { %v146_v21 = vld [vmem:[#allocation3 + $0xb] sm:$0xff]  ;;  %141 = vst [vmem:[#allocation3 + $0x90] sm:$0xff] %v140_v19  ;;  %143 = vst [vmem:[#allocation3 + $0x98] sm:$0xff] %v142_v20  ;;  %v148_v22 = vld [vmem:[#allocation3 + $0x13] sm:$0xff] }
  0x74   :  { %147 = vst [vmem:[#allocation3 + $0xb0] sm:$0xff] %v146_v21  ;;  %v152_v23 = vld [vmem:[#allocation3 + $0xa] sm:$0xff]  ;;  %v154_v24 = vld [vmem:[#allocation3 + $0x12] sm:$0xff]  ;;  %149 = vst [vmem:[#allocation3 + $0xb8] sm:$0xff] %v148_v22 }
  0x75   :  { %153 = vst [vmem:[#allocation3 + $0xd0] sm:$0xff] %v152_v23  ;;  %155 = vst [vmem:[#allocation3 + $0xd8] sm:$0xff] %v154_v24  ;;  %v158_v25 = vld [vmem:[#allocation3 + $0x9] sm:$0xff]  ;;  %v160_v26 = vld [vmem:[#allocation3 + $0x11] sm:$0xff] }
  0x76   :  { %159 = vst [vmem:[#allocation3 + $0xf0] sm:$0xff] %v158_v25  ;;  %161 = vst [vmem:[#allocation3 + $0xf8] sm:$0xff] %v160_v26 }
  0x77 LB: > { %s372_s26 = sshll.u32 %s546_s24, 3  ;;  %s695_s29 = smov 0   ;;  %s546_s24 = sphi %s687_s24, %s167_s24  }
  0x78   : > { %s169_s28 = scalar_lea.vmem [#allocation7], %s372_s26 }
  0x79   : > { %v373_v27 = vld [vmem:[%s169_s28] ss:$0 sm:$0xff]  ;;  %v376_v28 = vld [vmem:[%s169_s28 + $0x1] ss:$0 sm:$0xff]  ;;  %v379_v29 = vld [vmem:[%s169_s28 + $0x2] ss:$0 sm:$0xff] }
  0x7a   : > { %v382_v30 = vld [vmem:[%s169_s28 + $0x3] ss:$0 sm:$0xff]  ;;  %v385_v31 = vld [vmem:[%s169_s28 + $0x4] ss:$0 sm:$0xff]  ;;  %v388_v32 = vld [vmem:[%s169_s28 + $0x5] ss:$0 sm:$0xff] }
  0x7b   : > { %v391_v33 = vld [vmem:[%s169_s28 + $0x6] ss:$0 sm:$0xff]  ;;  %v394_v34 = vld [vmem:[%s169_s28 + $0x7] ss:$0 sm:$0xff] }
  0x7c LB: >> { %s395_s6 = sshll.u32 %s550_s29, 3  ;;  %s229_s29 = sadd.s32 1, %s550_s29   ;;  %s550_s29 = sphi %s695_s29, %s229_s29  }
  0x7d   : >> { %s231_s0 = sadd.s32 16, %s395_s6  ;;  %s271_s30 = scalar_lea.vmem [#allocation2], %s395_s6 }
  0x7e   : >> { %s232_s7 = ssub.s32 %s231_s0, %s372_s26  ;;  %v272_v57 = vld [vmem:[%s271_s30] sm:$0xff]  ;;  %p226_p12 = scmp.ge.s32.totalorder %s229_s29, 2  }
  0x7f   : >> { %s233_s25 = scalar_lea.vmem [#allocation3], %s232_s7  ;;  %s167_s24 = sadd.s32 (%p226_p12), 1, %s546_s24  }
  0x80   : >> { %v234_v35 = vld [vmem:[%s233_s25] sm:$0xff]  ;;  %p164_p13 = scmp.ge.s32.totalorder (%p226_p12), %s167_s24, 2  }
  0x81   : >> { %v396_v36 = vld [vmem:[%s233_s25 + $0x20] sm:$0xff]  ;;  %v235_v38 = vmul.f32 %v373_v27, %v234_v35 }
  0x82   : >> { %v397_v37 = vld [vmem:[%s233_s25 + $0x40] sm:$0xff]  ;;  %v239_v39 = vmul.f32 %v396_v36, %v376_v28 }
  0x83   : >> { %v243_v40 = vmul.f32 %v397_v37, %v379_v29  ;;  %v398_v41 = vld [vmem:[%s233_s25 + $0x60] sm:$0xff] }
  0x84   : >> { %v399_v42 = vld [vmem:[%s233_s25 + $0x80] sm:$0xff]  ;;  %v247_v44 = vmul.f32 %v398_v41, %v382_v30  ;;  %v264_v51 = vadd.f32 %v239_v39, %v235_v38 }
  0x85   : >> { %v400_v43 = vld [vmem:[%s233_s25 + $0xa0] sm:$0xff]  ;;  %v251_v45 = vmul.f32 %v399_v42, %v385_v31 }
  0x86   : >> { %v255_v46 = vmul.f32 %v400_v43, %v388_v32  ;;  %v401_v47 = vld [vmem:[%s233_s25 + $0xc0] sm:$0xff]  ;;  %v265_v52 = vadd.f32 %v247_v44, %v243_v40 }
  0x87   : >> { %v402_v48 = vld [vmem:[%s233_s25 + $0xe0] sm:$0xff]  ;;  %v259_v49 = vmul.f32 %v401_v47, %v391_v33 }
  0x88   : >> { %v263_v50 = vmul.f32 %v402_v48, %v394_v34  ;;  %v266_v53 = vadd.f32 %v255_v46, %v251_v45  ;;  %v268_v55 = vadd.f32 %v265_v52, %v264_v51 }
  0x8a   : >> { %v267_v54 = vadd.f32 %v263_v50, %v259_v49 }
  0x8c   : >> { %v269_v56 = vadd.f32 %v267_v54, %v266_v53  ;;  %228 = sbr.rel (!%p226_p12) target bundleno = 124 (0x7c), region = 95 }
  0x8e   : >> { %v270_v58 = vadd.f32 %v269_v56, %v268_v55 }
  0x90   : >> { %v273_v59 = vadd.f32 %v272_v57, %v270_v58 }
  0x92   : >> { %274 = vst [vmem:[%s271_s30] sm:$0xff] %v273_v59 }
  0x93   :  { %166 = sbr.rel (!%p164_p13) target bundleno = 119 (0x77), region = 106 }
  0x9a   :  { %277 = sbr.rel (%p370_p10) target bundleno = 161 (0xa1), region = 55  ;;  %v278_v60 = vld [vmem:[#allocation2] sm:$0xff] (!%p370_p10)  ;;  %v279_v61 = vld [vmem:[#allocation2 + $0x8] sm:$0xff] (!%p370_p10) }
  0x9b   :  { %280 = vst [vmem:[#allocation13] sm:$0xff] (!%p370_p10), %v278_v60  ;;  %281 = vst [vmem:[#allocation13 + $0x8] sm:$0xff] (!%p370_p10), %v279_v61 }
  0xa1 PF:  { %s284_s3 = sld [smem:[#allocation5]]  ;;  %s559_s11 = smov [#allocation13]  }
  0xa2   :  { %s291_s12 = sshll.u32 %s559_s11, 4  ;;  %s292_s12 = int_to_ptr.vmem [resolvable:$true] %s291_s12 }
  0xa3   :  { %s506_s16 = scalar_lea.vmem %s292_s12, 256  ;;  %p511_p1 = scmp.lt.s32.totalorder %s292_s12, %s292_s12 }
  0xa4   :  { %p507_p0 = scmp.ne.s32.totalorder %s292_s12, %s506_s16  ;;  %p512_p2 = scmp.lt.s32.totalorder %s506_s16, %s506_s16 }
  0xa6   :  { %p513_p3 = por %p512_p2, %p511_p1 }
  0xa7   :  { %s409_s13 = sshll.u32 %s284_s3, 8 }
  0xa8   :  { %s290_s27 = scalar_lea.hbm %s731_s5, %s409_s13  ;;  %p514_p4 = pnand %p513_p3, %p507_p0 }
  0xaa   :  { %517 = shalt.err (!%p514_p4)
}
  0xab   :  { %s518_s1 = scalar_lea.hbm %s290_s27, 256  ;;  %s520_s18 = scalar_lea.hbm %s731_s5, 256 }
  0xac   :  { %p519_p5 = scmp.ne.s32.totalorder %s290_s27, %s518_s1  ;;  %p521_p6 = scmp.lt.u32.totalorder %s290_s27, %s731_s5 }
  0xad   :  { %p522_p7 = scmp.lt.u32.totalorder %s520_s18, %s518_s1  ;;  %p524_p9 = scmp.lt.u32.totalorder %s518_s1, %s290_s27 }
  0xaf   :  { %p523_p8 = por %p522_p7, %p521_p6 }
  0xb1   :  { %p525_p10 = por %p524_p9, %p523_p8 }
  0xb3   :  { %p526_p11 = pnand %p525_p10, %p519_p5 }
  0xb5   :  { %529 = shalt.err (!%p526_p11)
}
  0xb6   :  { %297 = dma.vmem_to_hbm [thread:$0]  %s292_s12, 256, %s290_s27, [#allocation9], %s555_s20, %s555_s20, %s556_s21  }
  0xb7   :  { %542 = dma.done.wait [#allocation9], 256  }
  0xb8   :  { %543 = vsyncadd [#allocation9], 4294967040 }
  0xb9   :  { %301 = vsyncpa [#allocation8], 1 }
  0xba   :  { %302 = vsyncpa [#allocation11], 1 }
  0xbb   :  { %303 = vsyncpa [#allocation9], 1 }

</bundles_post_ra>
